<compile_context>
chip_gen: v7x
topology: tpu7x:2x2x1
jax: 0.10.0
libtpu: 0.0.40
codegen_flags: <defaults>
</compile_context>

<pallas_src>
import jax
import jax.numpy as jnp
from jax.experimental import pallas as pl
from jax.experimental.pallas import tpu as pltpu

FC1_DIMS = 256
FC2_DIMS = 128
LN_EPS = 1e-5
LANE = 128          # lane-dense output width
MAX_TB = 256        # batch tile cap (fills MXU M-dim on v6e/v7x, keeps VMEM bounded)


def _round_up(n, m):
    return ((n + m - 1) // m) * m


def _layernorm(x, gamma, beta):
    mean = jnp.mean(x, axis=-1, keepdims=True)
    xc = x - mean                                    # hoisted, reused below
    var = jnp.mean(xc * xc, axis=-1, keepdims=True)
    return xc * jax.lax.rsqrt(var + LN_EPS) * gamma + beta


def actor_kernel(x_ref,
                 w1_ref, b1_ref, g1_ref, be1_ref,
                 w2_ref, b2_ref, g2_ref, be2_ref,
                 wmu_ref, bmu_ref,
                 o_ref):
    x = x_ref[...]                                   # bf16 (TB, obs_dims)

    # fc1 + LayerNorm + ReLU   (MXU in bf16, accumulate + LN in f32)
    h = jnp.dot(x, w1_ref[...], preferred_element_type=jnp.float32) + b1_ref[...]
    h = jnp.maximum(_layernorm(h, g1_ref[...], be1_ref[...]), 0.0)

    # fc2 + LayerNorm + ReLU
    h = jnp.dot(h.astype(jnp.bfloat16), w2_ref[...],
                preferred_element_type=jnp.float32) + b2_ref[...]
    h = jnp.maximum(_layernorm(h, g2_ref[...], be2_ref[...]), 0.0)

    # mu head (padded to 128 lanes) + sigmoid
    logits = jnp.dot(h.astype(jnp.bfloat16), wmu_ref[...],
                     preferred_element_type=jnp.float32) + bmu_ref[...]
    o_ref[...] = jax.nn.sigmoid(logits).astype(o_ref.dtype)


def actor_forward(x, params):
    """x: (batch, obs_dims) float32.  Returns (batch, actions_dims) float32."""
    batch, obs_dims = x.shape
    fc1 = params["w1"].shape[1]
    fc2 = params["w2"].shape[1]
    actions_dims = params["wmu"].shape[1]
    n_pad = _round_up(actions_dims, LANE)            # lane-dense output width

    # batch tiling: sublane-aligned, capped so a tile + resident weights stay well
    # inside the scoped VMEM limit on every generation (v7x has only 64 MiB total).
    tb = min(MAX_TB, _round_up(batch, 8))
    padded_batch = _round_up(batch, tb)

    xb = x.astype(jnp.bfloat16)
    if padded_batch != batch:
        xb = jnp.pad(xb, ((0, padded_batch - batch), (0, 0)))

    # pad mu head to lane-dense width (zeros -> sliced off afterwards)
    wmu = params["wmu"]
    bmu = params["bmu"]
    if n_pad != actions_dims:
        wmu = jnp.pad(wmu, ((0, 0), (0, n_pad - actions_dims)))
        bmu = jnp.pad(bmu, ((0, 0), (0, n_pad - actions_dims)))

    grid = (padded_batch // tb,)

    row_spec = lambda i: (i, 0)       # batch-tiled operands
    const_spec = lambda i: (0, 0)     # weights / LN params: resident across tiles

    in_specs = [
        pl.BlockSpec((tb, obs_dims), row_spec),        # x
        pl.BlockSpec((obs_dims, fc1), const_spec),     # w1
        pl.BlockSpec((1, fc1), const_spec),            # b1
        pl.BlockSpec((1, fc1), const_spec),            # g1
        pl.BlockSpec((1, fc1), const_spec),            # be1
        pl.BlockSpec((fc1, fc2), const_spec),          # w2
        pl.BlockSpec((1, fc2), const_spec),            # b2
        pl.BlockSpec((1, fc2), const_spec),            # g2
        pl.BlockSpec((1, fc2), const_spec),            # be2
        pl.BlockSpec((fc2, n_pad), const_spec),        # wmu (padded)
        pl.BlockSpec((1, n_pad), const_spec),          # bmu (padded)
    ]
    out_specs = pl.BlockSpec((tb, n_pad), row_spec)

    out = pl.pallas_call(
        actor_kernel,
        out_shape=jax.ShapeDtypeStruct((padded_batch, n_pad), jnp.float32),
        grid=grid,
        in_specs=in_specs,
        out_specs=out_specs,
        compiler_params=pltpu.CompilerParams(
            dimension_semantics=("parallel",)),        # shards batch tiles across TCs (v7x)
    )(xb,
      params["w1"], params["b1"], params["g1"], params["be1"],
      params["w2"], params["b2"], params["g2"], params["be2"],
      wmu, bmu)

    return out[:batch, :actions_dims]


def init_params(key, obs_dims, actions_dims,
                fc1_dims=FC1_DIMS, fc2_dims=FC2_DIMS):
    """Mirrors the PyTorch module's parameter shapes.
    Linear weights stored as (in, out) == torch weight.T, in bfloat16 (MXU-native);
    biases / LayerNorm params kept as (1, dim) float32 rows."""
    k1, k2, k3, k4, k5, k6 = jax.random.split(key, 6)

    def lin(kw, kb, fan_in, fan_out):
        bound = 1.0 / jnp.sqrt(fan_in)
        w = jax.random.uniform(kw, (fan_in, fan_out), jnp.float32, -bound, bound)
        b = jax.random.uniform(kb, (1, fan_out), jnp.float32, -bound, bound)
        return w.astype(jnp.bfloat16), b

    w1, b1 = lin(k1, k2, obs_dims, fc1_dims)
    w2, b2 = lin(k3, k4, fc1_dims, fc2_dims)
    wmu, bmu = lin(k5, k6, fc2_dims, actions_dims)

    return {
        "w1": w1, "b1": b1,
        "g1": jnp.ones((1, fc1_dims), jnp.float32),
        "be1": jnp.zeros((1, fc1_dims), jnp.float32),
        "w2": w2, "b2": b2,
        "g2": jnp.ones((1, fc2_dims), jnp.float32),
        "be2": jnp.zeros((1, fc2_dims), jnp.float32),
        "wmu": wmu, "bmu": bmu,
    }


def _reference_forward(x, p):
    """Pure-JAX reference using the same bf16-rounded operands as the kernel
    (bf16 x bf16 products are exact in f32, so this matches the MXU path)."""
    def q(a):
        return a.astype(jnp.bfloat16).astype(jnp.float32)

    def ln(h, g, b):
        m = jnp.mean(h, axis=-1, keepdims=True)
        c = h - m
        v = jnp.mean(c * c, axis=-1, keepdims=True)
        return c / jnp.sqrt(v + LN_EPS) * g + b

    w1, w2, wmu = q(p["w1"]), q(p["w2"]), q(p["wmu"])
    h = jnp.maximum(ln(q(x) @ w1 + p["b1"], p["g1"], p["be1"]), 0.0)
    h = jnp.maximum(ln(q(h) @ w2 + p["b2"], p["g2"], p["be2"]), 0.0)
    return jax.nn.sigmoid(q(h) @ wmu + p["bmu"])


if __name__ == "__main__":
    obs_dims = 16
    actions_dims = 4
    batch = 8

    key = jax.random.PRNGKey(0)
    k_obs, k_par = jax.random.split(key)

    obs = jax.random.normal(k_obs, (batch, obs_dims), jnp.float32)
    params = init_params(k_par, obs_dims, actions_dims)

    out = actor_forward(obs, params)
    out = jax.block_until_ready(out)

    ref = _reference_forward(obs, params)
    assert out.shape == (batch, actions_dims)
    assert jnp.allclose(out, ref, atol=2e-3, rtol=2e-3), "mismatch vs JAX reference"

    print("KERNEL_OK")
</pallas_src>

<mosaic_0001>
module attributes {stable_mosaic.version = 11 : i64} {
  func.func @actor_kernel(%arg0: i32, %arg1: memref<8x16xbf16, #tpu.memory_space<vmem>>, %arg2: memref<16x256xbf16, #tpu.memory_space<vmem>>, %arg3: memref<1x256xf32, #tpu.memory_space<vmem>>, %arg4: memref<1x256xf32, #tpu.memory_space<vmem>>, %arg5: memref<1x256xf32, #tpu.memory_space<vmem>>, %arg6: memref<256x128xbf16, #tpu.memory_space<vmem>>, %arg7: memref<1x128xf32, #tpu.memory_space<vmem>>, %arg8: memref<1x128xf32, #tpu.memory_space<vmem>>, %arg9: memref<1x128xf32, #tpu.memory_space<vmem>>, %arg10: memref<128x128xbf16, #tpu.memory_space<vmem>>, %arg11: memref<1x128xf32, #tpu.memory_space<vmem>>, %arg12: memref<8x128xf32, #tpu.memory_space<vmem>>) attributes {dimension_semantics = [#tpu.dimension_semantics<parallel>], iteration_bounds = array<i64: 1>, scalar_prefetch = 0 : i64, scratch_operands = 0 : i64, tpu.core_type = #tpu.core_type<tc>, window_params = [{transform_indices = @transform_0, window_bounds = array<i64: 8, 16>}, {pipeline_mode = #tpu.pipeline_mode<synchronous>, transform_indices = @transform_1, window_bounds = array<i64: 16, 256>}, {pipeline_mode = #tpu.pipeline_mode<synchronous>, transform_indices = @transform_2, window_bounds = array<i64: 1, 256>}, {pipeline_mode = #tpu.pipeline_mode<synchronous>, transform_indices = @transform_3, window_bounds = array<i64: 1, 256>}, {pipeline_mode = #tpu.pipeline_mode<synchronous>, transform_indices = @transform_4, window_bounds = array<i64: 1, 256>}, {pipeline_mode = #tpu.pipeline_mode<synchronous>, transform_indices = @transform_5, window_bounds = array<i64: 256, 128>}, {pipeline_mode = #tpu.pipeline_mode<synchronous>, transform_indices = @transform_6, window_bounds = array<i64: 1, 128>}, {pipeline_mode = #tpu.pipeline_mode<synchronous>, transform_indices = @transform_7, window_bounds = array<i64: 1, 128>}, {pipeline_mode = #tpu.pipeline_mode<synchronous>, transform_indices = @transform_8, window_bounds = array<i64: 1, 128>}, {pipeline_mode = #tpu.pipeline_mode<synchronous>, transform_indices = @transform_9, window_bounds = array<i64: 128, 128>}, {pipeline_mode = #tpu.pipeline_mode<synchronous>, transform_indices = @transform_10, window_bounds = array<i64: 1, 128>}, {transform_indices = @transform_11, window_bounds = array<i64: 8, 128>}]} {
    %c0 = arith.constant 0 : index
    %c0_0 = arith.constant 0 : index
    %0 = vector.load %arg1[%c0, %c0_0] : memref<8x16xbf16, #tpu.memory_space<vmem>>, vector<8x16xbf16>
    %c0_1 = arith.constant 0 : index
    %c0_2 = arith.constant 0 : index
    %1 = vector.load %arg2[%c0_1, %c0_2] : memref<16x256xbf16, #tpu.memory_space<vmem>>, vector<16x256xbf16>
    %cst = arith.constant dense<0.000000e+00> : vector<8x256xf32>
    %2 = tpu.matmul %0, %1, %cst {dimension_numbers = #tpu.dot_dimension_numbers<[1], [0], [0], [1], [0, 0, 1, 1], [], []>} : vector<8x16xbf16>, vector<16x256xbf16>, vector<8x256xf32> -> vector<8x256xf32>
    %c0_3 = arith.constant 0 : index
    %c0_4 = arith.constant 0 : index
    %3 = vector.load %arg3[%c0_3, %c0_4] : memref<1x256xf32, #tpu.memory_space<vmem>>, vector<1x256xf32>
    %4 = vector.broadcast %3 : vector<1x256xf32> to vector<8x256xf32>
    %5 = arith.addf %2, %4 : vector<8x256xf32>
    %c0_5 = arith.constant 0 : index
    %c0_6 = arith.constant 0 : index
    %6 = vector.load %arg4[%c0_5, %c0_6] : memref<1x256xf32, #tpu.memory_space<vmem>>, vector<1x256xf32>
    %c0_7 = arith.constant 0 : index
    %c0_8 = arith.constant 0 : index
    %7 = vector.load %arg5[%c0_7, %c0_8] : memref<1x256xf32, #tpu.memory_space<vmem>>, vector<1x256xf32>
    %cst_9 = arith.constant dense<0.000000e+00> : vector<8xf32>
    %8 = vector.multi_reduction <add>, %5, %cst_9 [1] : vector<8x256xf32> to vector<8xf32>
    %9 = vector.shape_cast %8 : vector<8xf32> to vector<8x1xf32>
    %cst_10 = arith.constant 2.560000e+02 : f32
    %10 = vector.broadcast %cst_10 : f32 to vector<8x1xf32>
    %11 = arith.divf %9, %10 : vector<8x1xf32>
    %12 = vector.broadcast %11 : vector<8x1xf32> to vector<8x256xf32>
    %13 = arith.subf %5, %12 : vector<8x256xf32>
    %14 = arith.mulf %13, %13 : vector<8x256xf32>
    %cst_11 = arith.constant dense<0.000000e+00> : vector<8xf32>
    %15 = vector.multi_reduction <add>, %14, %cst_11 [1] : vector<8x256xf32> to vector<8xf32>
    %16 = vector.shape_cast %15 : vector<8xf32> to vector<8x1xf32>
    %cst_12 = arith.constant 2.560000e+02 : f32
    %17 = vector.broadcast %cst_12 : f32 to vector<8x1xf32>
    %18 = arith.divf %16, %17 : vector<8x1xf32>
    %cst_13 = arith.constant 9.99999974E-6 : f32
    %19 = vector.broadcast %cst_13 : f32 to vector<8x1xf32>
    %20 = arith.addf %18, %19 : vector<8x1xf32>
    %21 = math.rsqrt %20 : vector<8x1xf32>
    %22 = vector.broadcast %21 : vector<8x1xf32> to vector<8x256xf32>
    %23 = arith.mulf %13, %22 : vector<8x256xf32>
    %24 = vector.broadcast %6 : vector<1x256xf32> to vector<8x256xf32>
    %25 = arith.mulf %23, %24 : vector<8x256xf32>
    %26 = vector.broadcast %7 : vector<1x256xf32> to vector<8x256xf32>
    %27 = arith.addf %25, %26 : vector<8x256xf32>
    %cst_14 = arith.constant 0.000000e+00 : f32
    %28 = vector.broadcast %cst_14 : f32 to vector<8x256xf32>
    %29 = arith.maximumf %27, %28 : vector<8x256xf32>
    %30 = arith.truncf %29 : vector<8x256xf32> to vector<8x256xbf16>
    %c0_15 = arith.constant 0 : index
    %c0_16 = arith.constant 0 : index
    %31 = vector.load %arg6[%c0_15, %c0_16] : memref<256x128xbf16, #tpu.memory_space<vmem>>, vector<256x128xbf16>
    %cst_17 = arith.constant dense<0.000000e+00> : vector<8x128xf32>
    %32 = tpu.matmul %30, %31, %cst_17 {dimension_numbers = #tpu.dot_dimension_numbers<[1], [0], [0], [1], [0, 0, 1, 1], [], []>} : vector<8x256xbf16>, vector<256x128xbf16>, vector<8x128xf32> -> vector<8x128xf32>
    %c0_18 = arith.constant 0 : index
    %c0_19 = arith.constant 0 : index
    %33 = vector.load %arg7[%c0_18, %c0_19] : memref<1x128xf32, #tpu.memory_space<vmem>>, vector<1x128xf32>
    %34 = vector.broadcast %33 : vector<1x128xf32> to vector<8x128xf32>
    %35 = arith.addf %32, %34 : vector<8x128xf32>
    %c0_20 = arith.constant 0 : index
    %c0_21 = arith.constant 0 : index
    %36 = vector.load %arg8[%c0_20, %c0_21] : memref<1x128xf32, #tpu.memory_space<vmem>>, vector<1x128xf32>
    %c0_22 = arith.constant 0 : index
    %c0_23 = arith.constant 0 : index
    %37 = vector.load %arg9[%c0_22, %c0_23] : memref<1x128xf32, #tpu.memory_space<vmem>>, vector<1x128xf32>
    %cst_24 = arith.constant dense<0.000000e+00> : vector<8xf32>
    %38 = vector.multi_reduction <add>, %35, %cst_24 [1] : vector<8x128xf32> to vector<8xf32>
    %39 = vector.shape_cast %38 : vector<8xf32> to vector<8x1xf32>
    %cst_25 = arith.constant 1.280000e+02 : f32
    %40 = vector.broadcast %cst_25 : f32 to vector<8x1xf32>
    %41 = arith.divf %39, %40 : vector<8x1xf32>
    %42 = vector.broadcast %41 : vector<8x1xf32> to vector<8x128xf32>
    %43 = arith.subf %35, %42 : vector<8x128xf32>
    %44 = arith.mulf %43, %43 : vector<8x128xf32>
    %cst_26 = arith.constant dense<0.000000e+00> : vector<8xf32>
    %45 = vector.multi_reduction <add>, %44, %cst_26 [1] : vector<8x128xf32> to vector<8xf32>
    %46 = vector.shape_cast %45 : vector<8xf32> to vector<8x1xf32>
    %cst_27 = arith.constant 1.280000e+02 : f32
    %47 = vector.broadcast %cst_27 : f32 to vector<8x1xf32>
    %48 = arith.divf %46, %47 : vector<8x1xf32>
    %cst_28 = arith.constant 9.99999974E-6 : f32
    %49 = vector.broadcast %cst_28 : f32 to vector<8x1xf32>
    %50 = arith.addf %48, %49 : vector<8x1xf32>
    %51 = math.rsqrt %50 : vector<8x1xf32>
    %52 = vector.broadcast %51 : vector<8x1xf32> to vector<8x128xf32>
    %53 = arith.mulf %43, %52 : vector<8x128xf32>
    %54 = vector.broadcast %36 : vector<1x128xf32> to vector<8x128xf32>
    %55 = arith.mulf %53, %54 : vector<8x128xf32>
    %56 = vector.broadcast %37 : vector<1x128xf32> to vector<8x128xf32>
    %57 = arith.addf %55, %56 : vector<8x128xf32>
    %cst_29 = arith.constant 0.000000e+00 : f32
    %58 = vector.broadcast %cst_29 : f32 to vector<8x128xf32>
    %59 = arith.maximumf %57, %58 : vector<8x128xf32>
    %60 = arith.truncf %59 : vector<8x128xf32> to vector<8x128xbf16>
    %c0_30 = arith.constant 0 : index
    %c0_31 = arith.constant 0 : index
    %61 = vector.load %arg10[%c0_30, %c0_31] : memref<128x128xbf16, #tpu.memory_space<vmem>>, vector<128x128xbf16>
    %cst_32 = arith.constant dense<0.000000e+00> : vector<8x128xf32>
    %62 = tpu.matmul %60, %61, %cst_32 {dimension_numbers = #tpu.dot_dimension_numbers<[1], [0], [0], [1], [0, 0, 1, 1], [], []>} : vector<8x128xbf16>, vector<128x128xbf16>, vector<8x128xf32> -> vector<8x128xf32>
    %c0_33 = arith.constant 0 : index
    %c0_34 = arith.constant 0 : index
    %63 = vector.load %arg11[%c0_33, %c0_34] : memref<1x128xf32, #tpu.memory_space<vmem>>, vector<1x128xf32>
    %64 = vector.broadcast %63 : vector<1x128xf32> to vector<8x128xf32>
    %65 = arith.addf %62, %64 : vector<8x128xf32>
    %66 = arith.negf %65 : vector<8x128xf32>
    %67 = math.exp %66 : vector<8x128xf32>
    %cst_35 = arith.constant 1.000000e+00 : f32
    %68 = vector.broadcast %cst_35 : f32 to vector<8x128xf32>
    %69 = arith.addf %68, %67 : vector<8x128xf32>
    %70 = arith.divf %68, %69 : vector<8x128xf32>
    %c0_36 = arith.constant 0 : index
    %c0_37 = arith.constant 0 : index
    %71 = vector.load %arg12[%c0_36, %c0_37] : memref<8x128xf32, #tpu.memory_space<vmem>>, vector<8x128xf32>
    tpu.vector_store %arg12[%c0_36, %c0_37], %70 {strides = array<i32>} : memref<8x128xf32, #tpu.memory_space<vmem>>, vector<8x128xf32>,
    return
  }
  func.func @transform_0(%arg0: i32) -> (i32, i32) {
    %c0_i32 = arith.constant 0 : i32
    %c0_i32_0 = arith.constant 0 : i32
    return %arg0, %c0_i32 : i32, i32
  }
  func.func @transform_1(%arg0: i32) -> (i32, i32) {
    %c0_i32 = arith.constant 0 : i32
    %c0_i32_0 = arith.constant 0 : i32
    %c0_i32_1 = arith.constant 0 : i32
    return %c0_i32, %c0_i32_0 : i32, i32
  }
  func.func @transform_2(%arg0: i32) -> (i32, i32) {
    %c0_i32 = arith.constant 0 : i32
    %c0_i32_0 = arith.constant 0 : i32
    %c0_i32_1 = arith.constant 0 : i32
    return %c0_i32, %c0_i32_0 : i32, i32
  }
  func.func @transform_3(%arg0: i32) -> (i32, i32) {
    %c0_i32 = arith.constant 0 : i32
    %c0_i32_0 = arith.constant 0 : i32
    %c0_i32_1 = arith.constant 0 : i32
    return %c0_i32, %c0_i32_0 : i32, i32
  }
  func.func @transform_4(%arg0: i32) -> (i32, i32) {
    %c0_i32 = arith.constant 0 : i32
    %c0_i32_0 = arith.constant 0 : i32
    %c0_i32_1 = arith.constant 0 : i32
    return %c0_i32, %c0_i32_0 : i32, i32
  }
  func.func @transform_5(%arg0: i32) -> (i32, i32) {
    %c0_i32 = arith.constant 0 : i32
    %c0_i32_0 = arith.constant 0 : i32
    %c0_i32_1 = arith.constant 0 : i32
    return %c0_i32, %c0_i32_0 : i32, i32
  }
  func.func @transform_6(%arg0: i32) -> (i32, i32) {
    %c0_i32 = arith.constant 0 : i32
    %c0_i32_0 = arith.constant 0 : i32
    %c0_i32_1 = arith.constant 0 : i32
    return %c0_i32, %c0_i32_0 : i32, i32
  }
  func.func @transform_7(%arg0: i32) -> (i32, i32) {
    %c0_i32 = arith.constant 0 : i32
    %c0_i32_0 = arith.constant 0 : i32
    %c0_i32_1 = arith.constant 0 : i32
    return %c0_i32, %c0_i32_0 : i32, i32
  }
  func.func @transform_8(%arg0: i32) -> (i32, i32) {
    %c0_i32 = arith.constant 0 : i32
    %c0_i32_0 = arith.constant 0 : i32
    %c0_i32_1 = arith.constant 0 : i32
    return %c0_i32, %c0_i32_0 : i32, i32
  }
  func.func @transform_9(%arg0: i32) -> (i32, i32) {
    %c0_i32 = arith.constant 0 : i32
    %c0_i32_0 = arith.constant 0 : i32
    %c0_i32_1 = arith.constant 0 : i32
    return %c0_i32, %c0_i32_0 : i32, i32
  }
  func.func @transform_10(%arg0: i32) -> (i32, i32) {
    %c0_i32 = arith.constant 0 : i32
    %c0_i32_0 = arith.constant 0 : i32
    %c0_i32_1 = arith.constant 0 : i32
    return %c0_i32, %c0_i32_0 : i32, i32
  }
  func.func @transform_11(%arg0: i32) -> (i32, i32) {
    %c0_i32 = arith.constant 0 : i32
    %c0_i32_0 = arith.constant 0 : i32
    return %arg0, %c0_i32 : i32, i32
  }
}

</mosaic_0001>

<bundles_post_ra>
// kernel: tpu_custom_call.1
= control target key start
LH: loop header
LB: loop body
LE: loop exit
PB: predicated region body
PF: predicated region fallthrough
CT: control target
= control target key end

     0   :  { %16 = vsyncpa [#allocation3], 0  ;;  %s963_s0 = inlined_call_operand.hbm [shape: bf16[8,16], index: 0, kind: input, shape index: {}]   ;;  %s964_s1 = inlined_call_operand.hbm [shape: bf16[16,256], index: 1, kind: input, shape index: {}]   ;;  %s965_s2 = inlined_call_operand.vmem [shape: f32[1,256], index: 2, kind: input, shape index: {}]   ;;  %s966_s3 = inlined_call_operand.vmem [shape: f32[1,256], index: 3, kind: input, shape index: {}]   ;;  %s967_s4 = inlined_call_operand.vmem [shape: f32[1,256], index: 4, kind: input, shape index: {}]   ;;  %s968_s5 = inlined_call_operand.hbm [shape: bf16[256,128], index: 5, kind: input, shape index: {}]   ;;  %s969_s6 = inlined_call_operand.vmem [shape: f32[1,128], index: 6, kind: input, shape index: {}]   ;;  %s970_s7 = inlined_call_operand.vmem [shape: f32[1,128], index: 7, kind: input, shape index: {}]   ;;  %s971_s8 = inlined_call_operand.vmem [shape: f32[1,128], index: 8, kind: input, shape index: {}]   ;;  %s972_s9 = inlined_call_operand.hbm [shape: bf16[128,128], index: 9, kind: input, shape index: {}]   ;;  %s973_s10 = inlined_call_operand.vmem [shape: f32[1,128], index: 10, kind: input, shape index: {}]   ;;  %s974_s11 = inlined_call_operand.hbm [shape: f32[8,128], index: 11, kind: output, shape index: {}]  }
   0x1   :  { %17 = vsyncpa [#allocation6], 0 }
   0x2   :  { %18 = vsyncpa [#allocation9], 0 }
   0x3   :  { %19 = vsyncpa [#allocation4], 0  ;;  %s800_s17 = smov [#allocation5]   ;;  %s682_s21 = scalar_lea.hbm %s964_s1, 256 }
   0x4   :  { %s35_s18 = sshll.u32 %s800_s17, 4  ;;  %p683_p0 = scmp.ne.s32.totalorder %s964_s1, %s682_s21  ;;  %s36_s18 = int_to_ptr.vmem [resolvable:$true] %s35_s18 }
   0x5   :  { %p686_p1 = scmp.lt.u32.totalorder %s682_s21, %s964_s1 }
   0x7   :  { %p688_p2 = pnand %p686_p1, %p683_p0 }
   0x9   :  { %691 = shalt.err (!%p688_p2)
}
   0xa   :  { %s692_s26 = scalar_lea.vmem %s36_s18, 256  ;;  %p697_p4 = scmp.lt.s32.totalorder %s36_s18, %s36_s18 }
   0xb   :  { %p693_p3 = scmp.ne.s32.totalorder %s36_s18, %s692_s26  ;;  %p698_p5 = scmp.lt.s32.totalorder %s692_s26, %s692_s26 }
   0xd   :  { %p699_p6 = por %p698_p5, %p697_p4 }
   0xf   :  { %p700_p7 = pnand %p699_p6, %p693_p3 }
  0x11   :  { %703 = shalt.err (!%p700_p7)
}
  0x12   :  { %s801_s27 = smov 128   ;;  %s802_s28 = smov 8  }
  0x13   :  { %41 = dma.hbm_to_vmem [thread:$0]  %s964_s1, 256, %s36_s18, [#allocation6], %s801_s27, %s801_s27, %s802_s28  }
  0x14   :  { %s803_s12 = smov [#allocation2]   ;;  %s804_s14 = smov [#allocation7]  }
  0x15   :  { %s26_s13 = sshll.u32 %s803_s12, 4  ;;  %s53_s15 = sshll.u32 %s804_s14, 4  ;;  %s27_s13 = int_to_ptr.vmem [resolvable:$true] %s26_s13  ;;  %s54_s15 = int_to_ptr.vmem [resolvable:$true] %s53_s15 }
  0x16   :  { %s704_s19 = scalar_lea.hbm %s963_s0, 64 }
  0x17   :  { %p705_p8 = scmp.ne.s32.totalorder %s963_s0, %s704_s19  ;;  %p708_p9 = scmp.lt.u32.totalorder %s704_s19, %s963_s0 }
  0x19   :  { %p710_p10 = pnand %p708_p9, %p705_p8 }
  0x1b   :  { %713 = shalt.err (!%p710_p10)
}
  0x1c   :  { %s714_s1 = scalar_lea.vmem %s27_s13, 64  ;;  %p719_p12 = scmp.lt.s32.totalorder %s27_s13, %s27_s13 }
  0x1d   :  { %p715_p11 = scmp.ne.s32.totalorder %s27_s13, %s714_s1  ;;  %p720_p13 = scmp.lt.s32.totalorder %s714_s1, %s714_s1 }
  0x1f   :  { %p721_p0 = por %p720_p13, %p719_p12 }
  0x21   :  { %p722_p1 = pnand %p721_p0, %p715_p11 }
  0x23   :  { %725 = shalt.err (!%p722_p1)
}
  0x24   :  { %29 = dma.hbm_to_vmem [thread:$0]  %s963_s0, 64, %s27_s13, [#allocation3]  }
  0x25   :  { %s726_s27 = scalar_lea.hbm %s968_s5, 2048 }
  0x26   :  { %p727_p2 = scmp.ne.s32.totalorder %s968_s5, %s726_s27  ;;  %p730_p3 = scmp.lt.u32.totalorder %s726_s27, %s968_s5 }
  0x28   :  { %p732_p4 = pnand %p730_p3, %p727_p2 }
  0x2a   :  { %735 = shalt.err (!%p732_p4)
}
  0x2b   :  { %s736_s14 = scalar_lea.vmem %s54_s15, 2048  ;;  %p741_p6 = scmp.lt.s32.totalorder %s54_s15, %s54_s15 }
  0x2c   :  { %p737_p5 = scmp.ne.s32.totalorder %s54_s15, %s736_s14  ;;  %p742_p7 = scmp.lt.s32.totalorder %s736_s14, %s736_s14 }
  0x2e   :  { %p743_p8 = por %p742_p7, %p741_p6 }
  0x30   :  { %p744_p9 = pnand %p743_p8, %p737_p5 }
  0x32   :  { %747 = shalt.err (!%p744_p9)
}
  0x33   :  { %s805_s0 = smov 64   ;;  %s806_s13 = smov 4  }
  0x34   :  { %59 = dma.hbm_to_vmem [thread:$0]  %s968_s5, 2048, %s54_s15, [#allocation6], %s805_s0, %s805_s0, %s806_s13  }
  0x35   :  { %s807_s19 = smov [#allocation8]   ;;  %s748_s23 = scalar_lea.hbm %s972_s9, 1024 }
  0x36   :  { %s71_s20 = sshll.u32 %s807_s19, 4  ;;  %p749_p10 = scmp.ne.s32.totalorder %s972_s9, %s748_s23  ;;  %s72_s20 = int_to_ptr.vmem [resolvable:$true] %s71_s20 }
  0x37   :  { %p752_p11 = scmp.lt.u32.totalorder %s748_s23, %s972_s9 }
  0x39   :  { %p754_p12 = pnand %p752_p11, %p749_p10 }
  0x3b   :  { %757 = shalt.err (!%p754_p12)
}
  0x3c   :  { %s758_s26 = scalar_lea.vmem %s72_s20, 1024  ;;  %p763_p0 = scmp.lt.s32.totalorder %s72_s20, %s72_s20 }
  0x3d   :  { %p759_p13 = scmp.ne.s32.totalorder %s72_s20, %s758_s26  ;;  %p764_p1 = scmp.lt.s32.totalorder %s758_s26, %s758_s26 }
  0x3f   :  { %p765_p2 = por %p764_p1, %p763_p0 }
  0x41   :  { %p766_p3 = pnand %p765_p2, %p759_p13 }
  0x43   :  { %769 = shalt.err (!%p766_p3)
}
  0x44   :  { %77 = dma.hbm_to_vmem [thread:$0]  %s972_s9, 1024, %s72_s20, [#allocation9], %s805_s0, %s805_s0, %s806_s13  }
  0x45   :  { %792 = dma.done.wait [#allocation3], 64  }
  0x46   :  { %793 = vsyncadd [#allocation3], 4294967232 }
  0x47   :  { %794 = dma.done.wait [#allocation6], 2304  }
  0x48   :  { %795 = vsyncadd [#allocation6], 4294964992 }
  0x49   :  { %796 = dma.done.wait [#allocation9], 1024  }
  0x4a   :  { %797 = vsyncadd [#allocation9], 4294966272  ;;  %v808_v0 = vmov 0   ;;  %v647_v1 = vld [vmem:[#allocation5 + $0x4] ss:$8 sps:$4 sm:$0xff]   ;;  %vm118_vm0 = vcmask 130048   ;;  %v98_v4 = vlaneseq }
  0x4b   :  { %154 = vmatprep.mubr.bf16.mxu0 %v808_v0  ;;  %v649_v2 = vld [vmem:[#allocation5] ss:$8 sps:$4 sm:$0xff]   ;;  %v93_v3 = vld [vmem:[#allocation2] sm:$0xf]  ;;  %122 = vmatprep.subr.bf16.mxu0 %v647_v1  ;;  %v650_v18 = vld [vmem:[#allocation7 + $0x40] sm:$0xff]   ;;  %vm810_vm1 = vmmov 0  }
  0x4c   :  { %123 = vmatpush1.bf16.msra.mxu0 %v649_v2  ;;  %v99_v5 = vshrl.u32 %v98_v4, 7  ;;  %v96_v7 = vld [vmem:[%s965_s2] sm:$0x3]  ;;  %v651_v19 = vld [vmem:[#allocation7] sm:$0xff]   ;;  %584 = vmatprep.subr.bf16.mxu1 %v650_v18  ;;  %v654_v29 = vld [vmem:[#allocation7 + $0x50] sm:$0xff]  }
  0x4d   :  { %v652_v20 = vld [vmem:[#allocation7 + $0x48] sm:$0xff]   ;;  %585 = vmatpush3.bf16.msra.mxu1 %v651_v19  ;;  %v655_v30 = vld [vmem:[#allocation7 + $0x10] sm:$0xff]   ;;  %v656_v31 = vld [vmem:[#allocation7 + $0x58] sm:$0xff]  }
  0x4e   :  { %v920_v6 = vsub.s32 0, %v99_v5  ;;  %v925_v8 = vsub.s32 1, %v99_v5  ;;  %v653_v21 = vld [vmem:[#allocation7 + $0x8] sm:$0xff]   ;;  %586 = vmatprep.subr.bf16.mxu1 %v652_v20  ;;  %v657_v32 = vld [vmem:[#allocation7 + $0x18] sm:$0xff]   ;;  %v658_v33 = vld [vmem:[#allocation7 + $0x60] sm:$0xff]   ;;  %v809_v5 = vmov 0.0  }
  0x4f   :  { %554 = vmatmul.mubr.msk.bf16.vlgmr.msra.gmra.mrb[0].mxu0 %vm118_vm0, %v93_v3  ;;  %v659_v34 = vld [vmem:[#allocation7 + $0x20] sm:$0xff]   ;;  %v660_v35 = vld [vmem:[#allocation7 + $0x68] sm:$0xff]   ;;  %v662_v37 = vld [vmem:[#allocation7 + $0x70] sm:$0xff]   ;;  %615 = vmatprep.subr.bf16.mxu0 %v809_v5 }
  0x50   :  { %v101_v9 = vrot.slane %v96_v7, %v920_v6  ;;  %v105_v10 = vrot.slane %v96_v7, %v925_v8  ;;  %v661_v36 = vld [vmem:[#allocation7 + $0x28] sm:$0xff]   ;;  %v663_v38 = vld [vmem:[#allocation7 + $0x30] sm:$0xff]   ;;  %v664_v39 = vld [vmem:[#allocation7 + $0x78] sm:$0xff]   ;;  %631 = vmatprep.mubr.msk.bf16.mxu0 %vm810_vm1, %v809_v5 }
  0x51   :  { %587 = vmatpush3.bf16.msra.mxu1 %v653_v21  ;;  %v665_v40 = vld [vmem:[#allocation7 + $0x38] sm:$0xff]   ;;  %v163_v44 = vld [vmem:[%s966_s3] sm:$0x3]  ;;  %v666_v4 = vld [vmem:[#allocation8] sm:$0xff]  }
  0x52   :  { %588 = vmatprep.subr.bf16.mxu1 %v654_v29  ;;  %v164_v45 = vld [vmem:[%s967_s4] sm:$0x3]  ;;  %v186_v46 = vrot.slane %v163_v44, %v920_v6  ;;  %v190_v47 = vrot.slane %v163_v44, %v925_v8  ;;  %616 = vmatpush3.bf16.msra.mxu0 %v666_v4 }
  0x53   :  { %v199_v50 = vrot.slane %v164_v45, %v920_v6  ;;  %v203_v51 = vrot.slane %v164_v45, %v925_v8  ;;  %v555_v63 = vld [vmem:[%s969_s6] ss:$0 sm:$0xff]  ;;  %617 = vmatprep.subr.bf16.mxu0 %v809_v5 }
  0x54   :  { %v667_v6 = vld [vmem:[#allocation8 + $0x8] sm:$0xff]  }
  0x55   :  { %589 = vmatpush3.bf16.msra.mxu1 %v655_v30  ;;  %v572_v21 = vld [vmem:[%s970_s7] ss:$0 sm:$0xff]  ;;  %s811_s7 = smov [#allocation10]  }
  0x56   :  { %590 = vmatprep.subr.bf16.mxu1 %v656_v31  ;;  %618 = vmatpush3.bf16.msra.mxu0 %v667_v6 }
  0x57   :  { %619 = vmatprep.subr.bf16.mxu0 %v809_v5 }
  0x59   :  { %591 = vmatpush3.bf16.msra.mxu1 %v657_v32 }
  0x5a   :  { %592 = vmatprep.subr.bf16.mxu1 %v658_v33 }
  0x5d   :  { %593 = vmatpush3.bf16.msra.mxu1 %v659_v34 }
  0x5e   :  { %594 = vmatprep.subr.bf16.mxu1 %v660_v35 }
  0x61   :  { %595 = vmatpush3.bf16.msra.mxu1 %v661_v36 }
  0x62   :  { %596 = vmatprep.subr.bf16.mxu1 %v662_v37 }
  0x65   :  { %597 = vmatpush3.bf16.msra.mxu1 %v663_v38 }
  0x66   :  { %598 = vmatprep.subr.bf16.mxu1 %v664_v39 }
  0x69   :  { %599 = vmatpush3.bf16.msra.mxu1 %v665_v40 }
 0x122   :  { %v156_v11 = vpop.f32.mrb[0].mxu0 }
 0x123   :  { %v157_v12 = vadd.f32 %v156_v11, %v101_v9  ;;  %v158_v13 = vpop.f32.mrb[1].mxu0  ;;  %v668_v11 = vld [vmem:[#allocation8 + $0x10] sm:$0xff]  }
 0x124   :  { %v159_v14 = vadd.f32 %v158_v13, %v105_v10  ;;  %v160_v15 = vpop.f32.mrb[2].mxu0  ;;  %620 = vmatpush3.bf16.msra.mxu0 %v668_v11  ;;  %v670_v13 = vld [vmem:[#allocation8 + $0x20] sm:$0xff]  }
 0x125   :  { %v161_v16 = vpop.f32.mrb[3].mxu0  ;;  %621 = vmatprep.subr.bf16.mxu0 %v809_v5  ;;  %v672_v15 = vld [vmem:[#allocation8 + $0x30] sm:$0xff]  }
 0x126   :  { %v165_v17 = vadd.f32 %v159_v14, %v157_v12  ;;  %v673_v16 = vld [vmem:[#allocation8 + $0x38] sm:$0xff]  }
 0x128   :  { %166 = vadd.xlane.f32.xlu0 %v165_v17 }
 0x1b5   :  { %v167_v22 = vpop.xlane.xlu0 %166 }
 0x1b6   :  { %v169_v23 = vmul.f32 0.00390625, %v167_v22 }
 0x1b8   :  { %v170_v24 = vsub.f32 %v157_v12, %v169_v23  ;;  %v171_v25 = vsub.f32 %v159_v14, %v169_v23  ;;  %v669_v12 = vld [vmem:[#allocation8 + $0x18] sm:$0xff]   ;;  %v671_v14 = vld [vmem:[#allocation8 + $0x28] sm:$0xff]  }
 0x1b9   :  { %622 = vmatpush3.bf16.msra.mxu0 %v669_v12  ;;  %v573_v23 = vld [vmem:[%s971_s8] ss:$0 sm:$0xff]  ;;  %s541_s8 = sshll.u32 %s811_s7, 4  ;;  %s542_s8 = int_to_ptr.vmem [resolvable:$true] %s541_s8 }
 0x1ba   :  { %v172_v26 = vmul.f32 %v170_v24, %v170_v24  ;;  %v173_v27 = vmul.f32 %v171_v25, %v171_v25  ;;  %623 = vmatprep.subr.bf16.mxu0 %v809_v5  ;;  %s770_s17 = scalar_lea.vmem %s542_s8, 128  ;;  %p775_p5 = scmp.lt.s32.totalorder %s542_s8, %s542_s8 }
 0x1bb   :  { %p771_p4 = scmp.ne.s32.totalorder %s542_s8, %s770_s17  ;;  %p776_p6 = scmp.lt.s32.totalorder %s770_s17, %s770_s17 }
 0x1bc   :  { %v174_v28 = vadd.f32 %v173_v27, %v172_v26 }
 0x1bd   :  { %624 = vmatpush3.bf16.msra.mxu0 %v670_v13  ;;  %p777_p7 = por %p776_p6, %p775_p5 }
 0x1be   :  { %175 = vadd.xlane.f32.xlu0 %v174_v28  ;;  %625 = vmatprep.subr.bf16.mxu0 %v809_v5  ;;  %v574_v28 = vld [vmem:[%s973_s10] ss:$0 sm:$0xff] }
 0x1bf   :  { %p778_p8 = pnand %p777_p7, %p771_p4 }
 0x1c1   :  { %626 = vmatpush3.bf16.msra.mxu0 %v671_v14 }
 0x1c2   :  { %627 = vmatprep.subr.bf16.mxu0 %v809_v5 }
 0x1c5   :  { %628 = vmatpush3.bf16.msra.mxu0 %v672_v15 }
 0x1c6   :  { %629 = vmatprep.subr.bf16.mxu0 %v809_v5 }
 0x1c9   :  { %630 = vmatpush3.bf16.msra.mxu0 %v673_v16 }
 0x24b   :  { %v176_v41 = vpop.xlane.xlu0 %175 }
 0x24c   :  { %v177_v42 = vmul.f32 0.00390625, %v176_v41 }
 0x24e   :  { %v178_v43 = vadd.f32 1e-05, %v177_v42 }
 0x250   :  { %674 = vrsqrt.f32 %v178_v43 }
 0x25a   :  { %v675_v48 = vpop.eup %674 }
 0x25b   :  { %v181_v49 = vmul.f32 %v675_v48, %v171_v25  ;;  %v180_v52 = vmul.f32 %v675_v48, %v170_v24 }
 0x25d   :  { %v194_v53 = vmul.f32 %v190_v47, %v181_v49  ;;  %v193_v54 = vmul.f32 %v186_v46, %v180_v52 }
 0x25f   :  { %v207_v55 = vadd.f32 %v203_v51, %v194_v53  ;;  %v206_v56 = vadd.f32 %v199_v50, %v193_v54 }
 0x261   :  { %v209_v57 = vmax.f32 %v207_v55, 0.0  ;;  %v208_v58 = vmax.f32 %v206_v56, 0.0 }
 0x263   :  { %v211_v59 = vpack.c.bf16 %v209_v57, %v209_v57  ;;  %v210_v60 = vpack.c.bf16 %v208_v58, %v208_v58 }
 0x265   :  { %379 = vmatprep.mubr.bf16.mxu1 %v211_v59 }
 0x266   :  { %380 = vmatmul.mubr.bf16.vlgmr.msra.gmra.mrb[0].mxu1 %v210_v60 }
 0x339   :  { %v600_v61 = vpop.f32.mrb[0].mxu1 }
 0x33a   :  { %v601_v62 = vpop.f32.mrb[1].mxu1 }
 0x33b   :  { %v602_v0 = vadd.f32 %v601_v62, %v600_v61  ;;  %v603_v1 = vpop.f32.mrb[2].mxu1 }
 0x33c   :  { %v604_v2 = vpop.f32.mrb[3].mxu1 }
 0x33d   :  { %v382_v3 = vadd.f32 %v602_v0, %v555_v63 }
 0x33f   :  { %389 = vadd.xlane.f32.xlu1 %v382_v3 }
 0x3cc   :  { %v390_v7 = vpop.xlane.xlu1 %389 }
 0x3cd   :  { %v392_v8 = vmul.f32 0.0078125, %v390_v7 }
 0x3cf   :  { %v393_v9 = vsub.f32 %v382_v3, %v392_v8 }
 0x3d1   :  { %v394_v10 = vmul.f32 %v393_v9, %v393_v9 }
 0x3d3   :  { %395 = vadd.xlane.f32.xlu1 %v394_v10 }
 0x460   :  { %v396_v17 = vpop.xlane.xlu1 %395 }
 0x461   :  { %v397_v18 = vmul.f32 0.0078125, %v396_v17 }
 0x463   :  { %v398_v19 = vadd.f32 1e-05, %v397_v18 }
 0x465   :  { %676 = vrsqrt.f32 %v398_v19 }
 0x46f   :  { %v677_v20 = vpop.eup %676 }
 0x470   :  { %v400_v22 = vmul.f32 %v677_v20, %v393_v9 }
 0x472   :  { %v407_v24 = vmul.f32 %v572_v21, %v400_v22 }
 0x474   :  { %v414_v25 = vadd.f32 %v573_v23, %v407_v24 }
 0x476   :  { %v415_v26 = vmax.f32 %v414_v25, 0.0 }
 0x478   :  { %v416_v27 = vpack.c.bf16 %v415_v26, %v415_v26 }
 0x47a   :  { %632 = vmatmul.mubr.bf16.vlgmr.msra.gmra.mrb[4].mxu0 %v416_v27 }
 0x54d   :  { %v522_v29 = vpop.f32.mrb[4].mxu0 }
 0x54e   :  { %v523_v30 = vadd.f32 %v574_v28, %v522_v29  ;;  %v633_v31 = vpop.f32.mrb[5].mxu0 }
 0x54f   :  { %v525_v32 = vpop.f32.mrb[6].mxu0 }
 0x550   :  { %v583_v33 = vmul.f32 -1.442695, %v523_v30  ;;  %v634_v34 = vpop.f32.mrb[7].mxu0 }
 0x552   :  { %678 = vpow2.f32 %v583_v33 }
 0x55c   :  { %v679_v35 = vpop.eup %678 }
 0x55d   :  { %v531_v36 = vadd.f32 1.0, %v679_v35 }
 0x55f   :  { %680 = vrcp.f32 %v531_v36 }
 0x569   :  { %v681_v37 = vpop.eup %680 }
 0x56a   :  { %534 = vst [vmem:[#allocation10] sm:$0xff] %v681_v37 }
 0x56b   :  { %781 = shalt.err (!%p778_p8)
}
 0x56c   :  { %s782_s20 = scalar_lea.hbm %s974_s11, 128 }
 0x56d   :  { %p783_p9 = scmp.ne.s32.totalorder %s974_s11, %s782_s20  ;;  %p786_p10 = scmp.lt.u32.totalorder %s782_s20, %s974_s11 }
 0x56f   :  { %p788_p11 = pnand %p786_p10, %p783_p9 }
 0x571   :  { %791 = shalt.err (!%p788_p11)
}
 0x572   :  { %544 = dma.vmem_to_hbm [thread:$0]  %s542_s8, 128, %s974_s11, [#allocation4]  }
 0x573   :  { %798 = dma.done.wait [#allocation4], 128  }
 0x574   :  { %799 = vsyncadd [#allocation4], 4294967168 }
 0x575   :  { %548 = vsyncpa [#allocation3], 1 }
 0x576   :  { %549 = vsyncpa [#allocation6], 1 }
 0x577   :  { %550 = vsyncpa [#allocation9], 1 }
 0x578   :  { %551 = vsyncpa [#allocation4], 1 }

</bundles_post_ra>
